<compile_context>
chip_gen: v5e
topology: v5e:2x2
jax: 0.10.0
libtpu: 0.0.40
codegen_flags: <defaults>
</compile_context>

<pallas_src>
import functools
import math

import jax
import jax.numpy as jnp
from jax.experimental import pallas as pl
from jax.experimental.pallas import tpu as pltpu


def _mlp_fused_kernel(*refs, layer_cfg, eps, neg_slope):
    """Fused forward for the whole MLP.

    refs = (x_ref, <per-layer param refs...>, o_ref)
    Per-layer param refs: w_t (in,out), b (1,out), and if use_ln: gamma (1,out), beta (1,out).
    layer_cfg: static tuple of (use_ln, use_act) per layer.
    """
    x_ref = refs[0]
    o_ref = refs[-1]
    param_refs = refs[1:-1]

    y = x_ref[...]
    idx = 0
    for use_ln, use_act in layer_cfg:
        w_ref = param_refs[idx]
        b_ref = param_refs[idx + 1]
        idx += 2

        # y = y @ W + b  (MXU, f32 accumulation). b is (1, out) -> broadcasts over batch.
        y = jnp.dot(y, w_ref[...], preferred_element_type=jnp.float32) + b_ref[...]

        if use_ln:
            g_ref = param_refs[idx]
            beta_ref = param_refs[idx + 1]
            idx += 2
            # nn.LayerNorm over the feature axis (biased variance, eps inside rsqrt).
            mean = jnp.mean(y, axis=-1, keepdims=True)
            var = jnp.mean((y - mean) * (y - mean), axis=-1, keepdims=True)
            y = (y - mean) * jax.lax.rsqrt(var + eps)
            y = y * g_ref[...] + beta_ref[...]

        if use_act:
            # nn.LeakyReLU(negative_slope=0.01)
            y = jnp.where(y >= 0, y, neg_slope * y)

    o_ref[...] = y.astype(o_ref.dtype)


def mlp_forward(x, params):
    """Full MLP forward as a single fused Pallas kernel call."""
    B = x.shape[0]
    out_f = params[-1]["w_t"].shape[1]
    layer_cfg = tuple((p["use_ln"], p["use_act"]) for p in params)

    inputs = [x]
    for p in params:
        inputs.append(p["w_t"])   # (in, out), pre-transposed at init
        inputs.append(p["b2"])    # (1, out)
        if p["use_ln"]:
            inputs.append(p["gamma2"])  # (1, out)
            inputs.append(p["beta2"])   # (1, out)

    kernel = functools.partial(
        _mlp_fused_kernel, layer_cfg=layer_cfg, eps=1e-5, neg_slope=0.01,
    )

    # No grid: every array is a single whole-array block resident in VMEM.
    vmem = pl.BlockSpec(memory_space=pltpu.MemorySpace.VMEM)
    return pl.pallas_call(
        kernel,
        out_shape=jax.ShapeDtypeStruct((B, out_f), x.dtype),
        in_specs=[vmem] * len(inputs),
        out_specs=vmem,
    )(*inputs)


def init_mlp_params(key, in_size, hidden_sizes, use_layer_norm):
    """Deterministic params matching PyTorch defaults.

    Linear: W, b ~ U(-1/sqrt(fan_in), 1/sqrt(fan_in)); LayerNorm: gamma=1, beta=0.
    Weights are stored pre-transposed as (in, out) and bias/gamma/beta pre-reshaped
    to (1, out) so the forward pass does no layout work outside the kernel.
    """
    params = []
    prev = in_size
    for i, h in enumerate(hidden_sizes):
        key, kw, kb = jax.random.split(key, 3)
        bound = 1.0 / math.sqrt(prev)
        w = jax.random.uniform(kw, (h, prev), jnp.float32, -bound, bound)  # PyTorch (out, in)
        b = jax.random.uniform(kb, (h,), jnp.float32, -bound, bound)
        is_last = (i == len(hidden_sizes) - 1)
        use_ln = use_layer_norm and not is_last
        params.append(dict(
            w_t=jnp.asarray(w).T.copy(),          # (in, out) -- transposed once, here
            b2=b.reshape(1, h),
            gamma2=jnp.ones((1, h), jnp.float32),
            beta2=jnp.zeros((1, h), jnp.float32),
            use_ln=use_ln,
            use_act=not is_last,
        ))
        prev = h
    return params


def mlp_forward_ref(x, params):
    """Pure-JAX reference for correctness checking."""
    for p in params:
        y = x @ p["w_t"] + p["b2"]
        if p["use_ln"]:
            mean = jnp.mean(y, axis=-1, keepdims=True)
            var = jnp.mean((y - mean) ** 2, axis=-1, keepdims=True)
            y = (y - mean) * jax.lax.rsqrt(var + 1e-5)
            y = y * p["gamma2"] + p["beta2"]
        if p["use_act"]:
            y = jnp.where(y >= 0, y, 0.01 * y)
        x = y
    return x


if __name__ == "__main__":
    key = jax.random.PRNGKey(0)
    key, kx = jax.random.split(key)

    # Shapes implied by the module: MLP(in_size=32, hidden_sizes=[64, 48, 16],
    # use_layer_norm=True), batch of 8 row vectors.
    B, in_size = 8, 32
    hidden_sizes = [64, 48, 16]
    use_layer_norm = True

    x = jax.random.normal(kx, (B, in_size), jnp.float32)
    params = init_mlp_params(key, in_size, hidden_sizes, use_layer_norm)

    out = mlp_forward(x, params)
    out = jax.block_until_ready(out)

    ref = mlp_forward_ref(x, params)
    assert out.shape == (B, hidden_sizes[-1])
    assert jnp.allclose(out, ref, atol=1e-5, rtol=1e-5), "mismatch vs pure-JAX reference"

    print("KERNEL_OK")
</pallas_src>

<mosaic_0001>
module attributes {stable_mosaic.version = 11 : i64} {
  func.func @_mlp_fused_kernel(%arg0: memref<8x32xf32, #tpu.memory_space<vmem>>, %arg1: memref<32x64xf32, #tpu.memory_space<vmem>>, %arg2: memref<1x64xf32, #tpu.memory_space<vmem>>, %arg3: memref<1x64xf32, #tpu.memory_space<vmem>>, %arg4: memref<1x64xf32, #tpu.memory_space<vmem>>, %arg5: memref<64x48xf32, #tpu.memory_space<vmem>>, %arg6: memref<1x48xf32, #tpu.memory_space<vmem>>, %arg7: memref<1x48xf32, #tpu.memory_space<vmem>>, %arg8: memref<1x48xf32, #tpu.memory_space<vmem>>, %arg9: memref<48x16xf32, #tpu.memory_space<vmem>>, %arg10: memref<1x16xf32, #tpu.memory_space<vmem>>, %arg11: memref<8x16xf32, #tpu.memory_space<vmem>>) attributes {dimension_semantics = [], scalar_prefetch = 0 : i64, scratch_operands = 0 : i64, tpu.core_type = #tpu.core_type<tc>} {
    %c0 = arith.constant 0 : index
    %c0_0 = arith.constant 0 : index
    %0 = vector.load %arg0[%c0, %c0_0] : memref<8x32xf32, #tpu.memory_space<vmem>>, vector<8x32xf32>
    %c0_1 = arith.constant 0 : index
    %c0_2 = arith.constant 0 : index
    %1 = vector.load %arg1[%c0_1, %c0_2] : memref<32x64xf32, #tpu.memory_space<vmem>>, vector<32x64xf32>
    %cst = arith.constant dense<0.000000e+00> : vector<8x64xf32>
    %2 = tpu.matmul %0, %1, %cst {dimension_numbers = #tpu.dot_dimension_numbers<[1], [0], [0], [1], [0, 0, 1, 1], [], []>} : vector<8x32xf32>, vector<32x64xf32>, vector<8x64xf32> -> vector<8x64xf32>
    %c0_3 = arith.constant 0 : index
    %c0_4 = arith.constant 0 : index
    %3 = vector.load %arg2[%c0_3, %c0_4] : memref<1x64xf32, #tpu.memory_space<vmem>>, vector<1x64xf32>
    %4 = vector.broadcast %3 : vector<1x64xf32> to vector<8x64xf32>
    %5 = arith.addf %2, %4 : vector<8x64xf32>
    %cst_5 = arith.constant dense<0.000000e+00> : vector<8xf32>
    %6 = vector.multi_reduction <add>, %5, %cst_5 [1] : vector<8x64xf32> to vector<8xf32>
    %7 = vector.shape_cast %6 : vector<8xf32> to vector<8x1xf32>
    %cst_6 = arith.constant 6.400000e+01 : f32
    %8 = vector.broadcast %cst_6 : f32 to vector<8x1xf32>
    %9 = arith.divf %7, %8 : vector<8x1xf32>
    %10 = vector.broadcast %9 : vector<8x1xf32> to vector<8x64xf32>
    %11 = arith.subf %5, %10 : vector<8x64xf32>
    %12 = vector.broadcast %9 : vector<8x1xf32> to vector<8x64xf32>
    %13 = arith.subf %5, %12 : vector<8x64xf32>
    %14 = arith.mulf %11, %13 : vector<8x64xf32>
    %cst_7 = arith.constant dense<0.000000e+00> : vector<8xf32>
    %15 = vector.multi_reduction <add>, %14, %cst_7 [1] : vector<8x64xf32> to vector<8xf32>
    %16 = vector.shape_cast %15 : vector<8xf32> to vector<8x1xf32>
    %cst_8 = arith.constant 6.400000e+01 : f32
    %17 = vector.broadcast %cst_8 : f32 to vector<8x1xf32>
    %18 = arith.divf %16, %17 : vector<8x1xf32>
    %19 = vector.broadcast %9 : vector<8x1xf32> to vector<8x64xf32>
    %20 = arith.subf %5, %19 : vector<8x64xf32>
    %cst_9 = arith.constant 9.99999974E-6 : f32
    %21 = vector.broadcast %cst_9 : f32 to vector<8x1xf32>
    %22 = arith.addf %18, %21 : vector<8x1xf32>
    %23 = math.rsqrt %22 : vector<8x1xf32>
    %24 = vector.broadcast %23 : vector<8x1xf32> to vector<8x64xf32>
    %25 = arith.mulf %20, %24 : vector<8x64xf32>
    %c0_10 = arith.constant 0 : index
    %c0_11 = arith.constant 0 : index
    %26 = vector.load %arg3[%c0_10, %c0_11] : memref<1x64xf32, #tpu.memory_space<vmem>>, vector<1x64xf32>
    %27 = vector.broadcast %26 : vector<1x64xf32> to vector<8x64xf32>
    %28 = arith.mulf %25, %27 : vector<8x64xf32>
    %c0_12 = arith.constant 0 : index
    %c0_13 = arith.constant 0 : index
    %29 = vector.load %arg4[%c0_12, %c0_13] : memref<1x64xf32, #tpu.memory_space<vmem>>, vector<1x64xf32>
    %30 = vector.broadcast %29 : vector<1x64xf32> to vector<8x64xf32>
    %31 = arith.addf %28, %30 : vector<8x64xf32>
    %cst_14 = arith.constant 0.000000e+00 : f32
    %32 = vector.broadcast %cst_14 : f32 to vector<8x64xf32>
    %33 = arith.cmpf oge, %31, %32 : vector<8x64xf32>
    %cst_15 = arith.constant 0.00999999977 : f32
    %34 = vector.broadcast %cst_15 : f32 to vector<8x64xf32>
    %35 = arith.mulf %34, %31 : vector<8x64xf32>
    %36 = arith.select %33, %31, %35 : vector<8x64xi1>, vector<8x64xf32>
    %c0_16 = arith.constant 0 : index
    %c0_17 = arith.constant 0 : index
    %37 = vector.load %arg5[%c0_16, %c0_17] : memref<64x48xf32, #tpu.memory_space<vmem>>, vector<64x48xf32>
    %cst_18 = arith.constant dense<0.000000e+00> : vector<8x48xf32>
    %38 = tpu.matmul %36, %37, %cst_18 {dimension_numbers = #tpu.dot_dimension_numbers<[1], [0], [0], [1], [0, 0, 1, 1], [], []>} : vector<8x64xf32>, vector<64x48xf32>, vector<8x48xf32> -> vector<8x48xf32>
    %c0_19 = arith.constant 0 : index
    %c0_20 = arith.constant 0 : index
    %39 = vector.load %arg6[%c0_19, %c0_20] : memref<1x48xf32, #tpu.memory_space<vmem>>, vector<1x48xf32>
    %40 = vector.broadcast %39 : vector<1x48xf32> to vector<8x48xf32>
    %41 = arith.addf %38, %40 : vector<8x48xf32>
    %cst_21 = arith.constant dense<0.000000e+00> : vector<8xf32>
    %42 = vector.multi_reduction <add>, %41, %cst_21 [1] : vector<8x48xf32> to vector<8xf32>
    %43 = vector.shape_cast %42 : vector<8xf32> to vector<8x1xf32>
    %cst_22 = arith.constant 4.800000e+01 : f32
    %44 = vector.broadcast %cst_22 : f32 to vector<8x1xf32>
    %45 = arith.divf %43, %44 : vector<8x1xf32>
    %46 = vector.broadcast %45 : vector<8x1xf32> to vector<8x48xf32>
    %47 = arith.subf %41, %46 : vector<8x48xf32>
    %48 = vector.broadcast %45 : vector<8x1xf32> to vector<8x48xf32>
    %49 = arith.subf %41, %48 : vector<8x48xf32>
    %50 = arith.mulf %47, %49 : vector<8x48xf32>
    %cst_23 = arith.constant dense<0.000000e+00> : vector<8xf32>
    %51 = vector.multi_reduction <add>, %50, %cst_23 [1] : vector<8x48xf32> to vector<8xf32>
    %52 = vector.shape_cast %51 : vector<8xf32> to vector<8x1xf32>
    %cst_24 = arith.constant 4.800000e+01 : f32
    %53 = vector.broadcast %cst_24 : f32 to vector<8x1xf32>
    %54 = arith.divf %52, %53 : vector<8x1xf32>
    %55 = vector.broadcast %45 : vector<8x1xf32> to vector<8x48xf32>
    %56 = arith.subf %41, %55 : vector<8x48xf32>
    %cst_25 = arith.constant 9.99999974E-6 : f32
    %57 = vector.broadcast %cst_25 : f32 to vector<8x1xf32>
    %58 = arith.addf %54, %57 : vector<8x1xf32>
    %59 = math.rsqrt %58 : vector<8x1xf32>
    %60 = vector.broadcast %59 : vector<8x1xf32> to vector<8x48xf32>
    %61 = arith.mulf %56, %60 : vector<8x48xf32>
    %c0_26 = arith.constant 0 : index
    %c0_27 = arith.constant 0 : index
    %62 = vector.load %arg7[%c0_26, %c0_27] : memref<1x48xf32, #tpu.memory_space<vmem>>, vector<1x48xf32>
    %63 = vector.broadcast %62 : vector<1x48xf32> to vector<8x48xf32>
    %64 = arith.mulf %61, %63 : vector<8x48xf32>
    %c0_28 = arith.constant 0 : index
    %c0_29 = arith.constant 0 : index
    %65 = vector.load %arg8[%c0_28, %c0_29] : memref<1x48xf32, #tpu.memory_space<vmem>>, vector<1x48xf32>
    %66 = vector.broadcast %65 : vector<1x48xf32> to vector<8x48xf32>
    %67 = arith.addf %64, %66 : vector<8x48xf32>
    %cst_30 = arith.constant 0.000000e+00 : f32
    %68 = vector.broadcast %cst_30 : f32 to vector<8x48xf32>
    %69 = arith.cmpf oge, %67, %68 : vector<8x48xf32>
    %cst_31 = arith.constant 0.00999999977 : f32
    %70 = vector.broadcast %cst_31 : f32 to vector<8x48xf32>
    %71 = arith.mulf %70, %67 : vector<8x48xf32>
    %72 = arith.select %69, %67, %71 : vector<8x48xi1>, vector<8x48xf32>
    %c0_32 = arith.constant 0 : index
    %c0_33 = arith.constant 0 : index
    %73 = vector.load %arg9[%c0_32, %c0_33] : memref<48x16xf32, #tpu.memory_space<vmem>>, vector<48x16xf32>
    %cst_34 = arith.constant dense<0.000000e+00> : vector<8x16xf32>
    %74 = tpu.matmul %72, %73, %cst_34 {dimension_numbers = #tpu.dot_dimension_numbers<[1], [0], [0], [1], [0, 0, 1, 1], [], []>} : vector<8x48xf32>, vector<48x16xf32>, vector<8x16xf32> -> vector<8x16xf32>
    %c0_35 = arith.constant 0 : index
    %c0_36 = arith.constant 0 : index
    %75 = vector.load %arg10[%c0_35, %c0_36] : memref<1x16xf32, #tpu.memory_space<vmem>>, vector<1x16xf32>
    %76 = vector.broadcast %75 : vector<1x16xf32> to vector<8x16xf32>
    %77 = arith.addf %74, %76 : vector<8x16xf32>
    %c0_37 = arith.constant 0 : index
    %c0_38 = arith.constant 0 : index
    %78 = vector.load %arg11[%c0_37, %c0_38] : memref<8x16xf32, #tpu.memory_space<vmem>>, vector<8x16xf32>
    tpu.vector_store %arg11[%c0_37, %c0_38], %77 {strides = array<i32>} : memref<8x16xf32, #tpu.memory_space<vmem>>, vector<8x16xf32>,
    return
  }
}

</mosaic_0001>

<bundles_post_ra>
// kernel: tpu_custom_call.1
= control target key start
LH: loop header
LB: loop body
LE: loop exit
PB: predicated region body
PF: predicated region fallthrough
CT: control target
= control target key end

     0   :  { %s441_s0 = inlined_call_operand.vmem [shape: f32[8,32], index: 0, kind: input, shape index: {}]   ;;  %s442_s1 = inlined_call_operand.vmem [shape: f32[32,64], index: 1, kind: input, shape index: {}]   ;;  %s443_s2 = inlined_call_operand.vmem [shape: f32[1,64], index: 2, kind: input, shape index: {}]   ;;  %s444_s3 = inlined_call_operand.vmem [shape: f32[1,64], index: 3, kind: input, shape index: {}]   ;;  %s445_s4 = inlined_call_operand.vmem [shape: f32[1,64], index: 4, kind: input, shape index: {}]   ;;  %s446_s5 = inlined_call_operand.vmem [shape: f32[64,48], index: 5, kind: input, shape index: {}]   ;;  %s447_s6 = inlined_call_operand.vmem [shape: f32[1,48], index: 6, kind: input, shape index: {}]   ;;  %s448_s7 = inlined_call_operand.vmem [shape: f32[1,48], index: 7, kind: input, shape index: {}]   ;;  %s449_s8 = inlined_call_operand.vmem [shape: f32[1,48], index: 8, kind: input, shape index: {}]   ;;  %s450_s9 = inlined_call_operand.vmem [shape: f32[48,16], index: 9, kind: input, shape index: {}]   ;;  %s451_s10 = inlined_call_operand.vmem [shape: f32[1,16], index: 10, kind: input, shape index: {}]   ;;  %s452_s11 = inlined_call_operand.hbm [shape: f32[8,16], index: 11, kind: output, shape index: {}]  }
   0x1   :  { %v43_v0 = vld [vmem:[%s442_s1 + $0x18] sm:$0xff]  ;;  %v42_v1 = vld [vmem:[%s442_s1 + $0x10] sm:$0xff]  ;;  %v41_v2 = vld [vmem:[%s442_s1 + $0x8] sm:$0xff] }
   0x2   :  { %64 = vmatpush.msra.mxu0 %v43_v0  ;;  %v40_v3 = vld [vmem:[%s442_s1] sm:$0xff] }
   0x4   :  { %65 = vmatpush.msra.mxu0 %v42_v1 }
   0x5   :  { %16 = vsyncpa [#allocation3], 0  ;;  %v39_v4 = vld [vmem:[%s441_s0] sm:$0xff]  ;;  %vm48_vm0 = vcmask 261120   ;;  %vm72_vm1 = vcmask 523264   ;;  %v291_v9 = vmov 64.0  }
   0x6   :  { %66 = vmatpush.msra.mxu0 %v41_v2  ;;  %v250_v5 = vld [vmem:[%s443_s2] ss:$0 sm:$0xff]  ;;  %257 = vrcp.f32 %v291_v9  ;;  %v122_v21 = vld [vmem:[%s446_s5 + $0x38] sm:$0xff]  ;;  %v121_v22 = vld [vmem:[%s446_s5 + $0x30] sm:$0xff]  ;;  %vm150_vm7 = vcmask 392192   ;;  %v292_v50 = vmov 48.0  }
   0x7   :  { %138 = vmatpush.msra.mxu1 %v122_v21  ;;  %v120_v23 = vld [vmem:[%s446_s5 + $0x28] sm:$0xff]  ;;  %v119_v24 = vld [vmem:[%s446_s5 + $0x20] sm:$0xff]  ;;  %v118_v25 = vld [vmem:[%s446_s5 + $0x18] sm:$0xff]  ;;  %s293_s20 = smov [#allocation2]   ;;  %s235_s23 = sshll.u32 %s452_s11, 4  ;;  %vm226_vm13 = vcmask 130048   ;;  %s236_s23 = int_to_ptr.hbm [resolvable:$true] %s235_s23 }
   0x8   :  { %67 = vmatpush.msra.mxu0 %v40_v3  ;;  %v117_v26 = vld [vmem:[%s446_s5 + $0x10] sm:$0xff]  ;;  %v116_v27 = vld [vmem:[%s446_s5 + $0x8] sm:$0xff]  ;;  %v115_v28 = vld [vmem:[%s446_s5] sm:$0xff]  ;;  %s233_s21 = sshll.u32 %s293_s20, 4  ;;  %s234_s21 = int_to_ptr.vmem [resolvable:$true] %s233_s21 }
   0x9   :  { %244 = vmatmul.msk.f32.vlgmr.msra.gmra.mxu0 %vm48_vm0, %v39_v4  ;;  %139 = vmatpush.msra.mxu1 %v121_v22  ;;  %v251_v38 = vld [vmem:[%s444_s3] ss:$0 sm:$0xff]  ;;  %v198_v62 = vld [vmem:[%s450_s9 + $0x28] sm:$0xff]  ;;  %v196_v0 = vld [vmem:[%s450_s9 + $0x18] sm:$0xff] }
   0xa   :  { %v252_v41 = vld [vmem:[%s445_s4] ss:$0 sm:$0xff]  ;;  %216 = vmatpush.msra.mxu2 %v198_v62  ;;  %v195_v1 = vld [vmem:[%s450_s9 + $0x10] sm:$0xff]  ;;  %v194_v2 = vld [vmem:[%s450_s9 + $0x8] sm:$0xff] }
   0xb   :  { %140 = vmatpush.msra.mxu1 %v120_v23  ;;  %v253_v46 = vld [vmem:[%s447_s6] ss:$0 sm:$0xff] }
   0xc   :  { %v258_v10 = vpop.eup %257  ;;  %v197_v63 = vld [vmem:[%s450_s9 + $0x20] sm:$0xff] }
   0xd   :  { %v77_v11 = vmul.f32 64.0, %v258_v10  ;;  %vm81_vm2 = vweird.f32 %v258_v10  ;;  %141 = vmatpush.msra.mxu1 %v119_v24  ;;  %217 = vmatpush.msra.mxu2 %v197_v63  ;;  %v193_v3 = vld [vmem:[%s450_s9] sm:$0xff] }
   0xe   :  { %v256_v21 = vld [vmem:[%s451_s10] ss:$0 sm:$0xff] }
   0xf   :  { %v78_v12 = vsub.f32 1.0, %v77_v11  ;;  %142 = vmatpush.msra.mxu1 %v118_v25  ;;  %218 = vmatpush.msra.mxu2 %v196_v0 }
  0x11   :  { %v79_v13 = vmul.f32 %v258_v10, %v78_v12  ;;  %143 = vmatpush.msra.mxu1 %v117_v26  ;;  %219 = vmatpush.msra.mxu2 %v195_v1 }
  0x13   :  { %v80_v14 = vadd.f32 %v258_v10, %v79_v13  ;;  %144 = vmatpush.msra.mxu1 %v116_v27  ;;  %220 = vmatpush.msra.mxu2 %v194_v2  ;;  %v254_v13 = vld [vmem:[%s448_s7] ss:$0 sm:$0xff] }
  0x15   :  { %v82_v15 = vsel %vm81_vm2, %v258_v10, %v80_v14  ;;  %145 = vmatpush.msra.mxu1 %v115_v28  ;;  %221 = vmatpush.msra.mxu2 %v193_v3 }
  0x86   :  { %v69_v6 = vpop.f32.mrf.mxu0 }
  0x87   :  { %v70_v7 = vadd.f32 %v250_v5, %v69_v6 }
  0x89   :  { %v73_v8 = vsel %vm72_vm1, %v70_v7, 0.0 }
  0x8a   :  { %74 = vadd.xlane.f32.xlu0 %v73_v8 }
  0xfd   :  { %v75_v16 = vpop.xlane.xlu0 %74 }
  0xfe   :  { %v83_v17 = vmul.f32 %v82_v15, %v75_v16  ;;  %v255_v16 = vld [vmem:[%s449_s8] ss:$0 sm:$0xff] }
 0x100   :  { %v84_v18 = vsub.f32 %v70_v7, %v83_v17 }
 0x102   :  { %v85_v19 = vmul.f32 %v84_v18, %v84_v18 }
 0x104   :  { %v86_v20 = vsel %vm72_vm1, %v85_v19, 0.0 }
 0x105   :  { %87 = vadd.xlane.f32.xlu0 %v86_v20 }
 0x178   :  { %v88_v29 = vpop.xlane.xlu0 %87 }
 0x179   :  { %v89_v30 = vmul.f32 %v88_v29, %v82_v15 }
 0x17b   :  { %v90_v31 = vadd.f32 1e-05, %v89_v30 }
 0x17d   :  { %259 = vrsqrt.f32 %v90_v31  ;;  %vm97_vm4 = vweird.f32 %v90_v31 }
 0x17e   :  { %261 = vrcp.f32 %v292_v50 }
 0x183   :  { %v260_v32 = vpop.eup %259 }
 0x184   :  { %v92_v33 = vmul.f32 %v260_v32, %v90_v31  ;;  %vm98_vm3 = vweird.f32 %v260_v32  ;;  %v262_v51 = vpop.eup %261 }
 0x185   :  { %vm99_vm5 = vmor %vm97_vm4, %vm98_vm3  ;;  %v155_v52 = vmul.f32 48.0, %v262_v51  ;;  %vm159_vm8 = vweird.f32 %v262_v51 }
 0x186   :  { %v93_v34 = vmul.f32 %v260_v32, %v92_v33 }
 0x187   :  { %v156_v53 = vsub.f32 1.0, %v155_v52 }
 0x188   :  { %v94_v35 = vmul.f32 0.5, %v93_v34 }
 0x189   :  { %v157_v54 = vmul.f32 %v262_v51, %v156_v53 }
 0x18a   :  { %v95_v36 = vsub.f32 1.5, %v94_v35 }
 0x18b   :  { %v158_v55 = vadd.f32 %v262_v51, %v157_v54 }
 0x18c   :  { %v96_v37 = vmul.f32 %v260_v32, %v95_v36 }
 0x18d   :  { %v160_v56 = vsel %vm159_vm8, %v262_v51, %v158_v55 }
 0x18e   :  { %v100_v39 = vsel %vm99_vm5, %v260_v32, %v96_v37 }
 0x18f   :  { %v101_v40 = vmul.f32 %v100_v39, %v84_v18 }
 0x191   :  { %v106_v42 = vmul.f32 %v251_v38, %v101_v40 }
 0x193   :  { %v111_v43 = vadd.f32 %v252_v41, %v106_v42 }
 0x195   :  { %vm112_vm6 = vcmp.ge.f32.partialorder %v111_v43, 0.0  ;;  %v113_v44 = vmul.f32 0.01, %v111_v43 }
 0x197   :  { %v114_v45 = vsel %vm112_vm6, %v111_v43, %v113_v44 }
 0x198   :  { %245 = vmatmul.msk.f32.vlgmr.msra.gmra.mxu1 %vm72_vm1, %v114_v45 }
 0x215   :  { %v147_v47 = vpop.f32.mrf.mxu1 }
 0x216   :  { %v148_v48 = vadd.f32 %v253_v46, %v147_v47 }
 0x218   :  { %v151_v49 = vsel %vm150_vm7, %v148_v48, 0.0 }
 0x219   :  { %152 = vadd.xlane.f32.xlu1 %v151_v49 }
 0x28c   :  { %v153_v57 = vpop.xlane.xlu1 %152 }
 0x28d   :  { %v161_v58 = vmul.f32 %v160_v56, %v153_v57 }
 0x28f   :  { %v162_v59 = vsub.f32 %v148_v48, %v161_v58 }
 0x291   :  { %v163_v60 = vmul.f32 %v162_v59, %v162_v59 }
 0x293   :  { %v164_v61 = vsel %vm150_vm7, %v163_v60, 0.0 }
 0x294   :  { %165 = vadd.xlane.f32.xlu1 %v164_v61 }
 0x307   :  { %v166_v4 = vpop.xlane.xlu1 %165 }
 0x308   :  { %v167_v5 = vmul.f32 %v166_v4, %v160_v56 }
 0x30a   :  { %v168_v6 = vadd.f32 1e-05, %v167_v5 }
 0x30c   :  { %263 = vrsqrt.f32 %v168_v6  ;;  %vm175_vm10 = vweird.f32 %v168_v6 }
 0x312   :  { %v264_v7 = vpop.eup %263 }
 0x313   :  { %v170_v8 = vmul.f32 %v264_v7, %v168_v6  ;;  %vm176_vm9 = vweird.f32 %v264_v7 }
 0x314   :  { %vm177_vm11 = vmor %vm175_vm10, %vm176_vm9 }
 0x315   :  { %v171_v9 = vmul.f32 %v264_v7, %v170_v8 }
 0x317   :  { %v172_v10 = vmul.f32 0.5, %v171_v9 }
 0x319   :  { %v173_v11 = vsub.f32 1.5, %v172_v10 }
 0x31b   :  { %v174_v12 = vmul.f32 %v264_v7, %v173_v11 }
 0x31d   :  { %v178_v14 = vsel %vm177_vm11, %v264_v7, %v174_v12 }
 0x31e   :  { %v179_v15 = vmul.f32 %v178_v14, %v162_v59 }
 0x320   :  { %v184_v17 = vmul.f32 %v254_v13, %v179_v15 }
 0x322   :  { %v189_v18 = vadd.f32 %v255_v16, %v184_v17 }
 0x324   :  { %vm190_vm12 = vcmp.ge.f32.partialorder %v189_v18, 0.0  ;;  %v191_v19 = vmul.f32 0.01, %v189_v18 }
 0x326   :  { %v192_v20 = vsel %vm190_vm12, %v189_v18, %v191_v19 }
 0x327   :  { %246 = vmatmul.msk.f32.vlgmr.msra.gmra.mxu2 %vm150_vm7, %v192_v20 }
 0x3aa   :  { %v223_v22 = vpop.f32.mrf.mxu2 }
 0x3ab   :  { %v224_v23 = vadd.f32 %v256_v21, %v223_v22 }
 0x3ad   :  { %227 = vst.msk [vmem:[#allocation2] sm:$0xff] %vm226_vm13, %v224_v23 }
 0x3ae   :  { %238 = dma.vmem_to_hbm [thread:$0]  %s234_s21, 128, %s236_s23, [#allocation3]  }
 0x3af   :  { %289 = dma.done.wait [#allocation3], 128  }
 0x3b0   :  { %290 = vsyncadd [#allocation3], 4294967168 }
 0x3b1   :  { %243 = vsyncpa [#allocation3], 1 }

</bundles_post_ra>
